<compile_context>
chip_gen: v7x
topology: tpu7x:2x2x1
jax: 0.10.0
libtpu: 0.0.40
codegen_flags: <defaults>
</compile_context>

<pallas_src>
import functools

import jax
import jax.numpy as jnp
from jax.experimental import pallas as pl
from jax.experimental.pallas import tpu as pltpu

_LANE = 128
_VMEM_BUDGET = 40 * 1024 * 1024   # conservative: leaves headroom on v7x (64 MiB VMEM)


def _round_up(x, m):
    return ((x + m - 1) // m) * m


def _wn_linear_kernel(x_ref, vt_ref, g_ref, b_ref, o_ref):
    """One (tm, tn) output tile: normalize this slice of V^T, matmul, add bias.

    weight_norm over each output column of V^T (== each output row of V):
        w[:, j] = g[j] * v[:, j] / ||v[:, j]||
    Norm math in f32 (rsqrt -> EUP slot), matmul operands in the storage dtype
    (bf16 fast path), accumulation in f32.
    """
    vt32 = vt_ref[...].astype(jnp.float32)                      # (K, tn)
    sumsq = jnp.sum(vt32 * vt32, axis=0, keepdims=True)         # (1, tn)
    inv = jax.lax.rsqrt(jnp.maximum(sumsq, 1e-12))              # eps guards padded cols
    w = (vt32 * (g_ref[...].astype(jnp.float32) * inv)).astype(vt_ref.dtype)

    y = jax.lax.dot_general(
        x_ref[...], w,
        dimension_numbers=(((1,), (0,)), ((), ())),
        preferred_element_type=jnp.float32)                     # (tm, tn) f32
    o_ref[...] = (y + b_ref[...].astype(jnp.float32)).astype(o_ref.dtype)


def feat_classifier_forward(x, vt, g, b, *, use_bf16_matmul=True, tm=512, tn=512,
                            vmem_budget_bytes=_VMEM_BUDGET):
    """y = x @ (g * V / ||V||_row)^T + b.

    x:  (M, K)        activations
    vt: (K, N)        V stored transposed (done once at init, not per call)
    g:  (N,)/(N,1)    weight_norm magnitudes
    b:  (N,)          bias
    """
    M, K = x.shape
    Kv, N = vt.shape
    assert K == Kv, (K, Kv)
    out_dtype = x.dtype

    # bf16 at the HBM boundary (v5e/v6e/v7x MXU are bf16-native and the kernel is
    # HBM-bandwidth bound at classifier shapes). Accumulation stays f32.
    if use_bf16_matmul:
        x = x.astype(jnp.bfloat16)
        vt = vt.astype(jnp.bfloat16)
    ib = jnp.dtype(x.dtype).itemsize
    ob = jnp.dtype(out_dtype).itemsize

    # Pad only the (small) parameter arrays so classes are lane-dense. x / output rows
    # rely on the "full-dim block" / aligned-partial-tile exceptions -> no big pad copies.
    Np = _round_up(N, _LANE)
    vt_p = jnp.pad(vt, ((0, 0), (0, Np - N))) if Np != N else vt
    g2 = jnp.reshape(g, (1, N)).astype(jnp.float32)
    b2 = jnp.reshape(b, (1, N)).astype(jnp.float32)
    if Np != N:
        g2 = jnp.pad(g2, ((0, 0), (0, Np - N)))
        b2 = jnp.pad(b2, ((0, 0), (0, Np - N)))

    cost = pl.CostEstimate(
        flops=2 * M * Np * K + 3 * K * Np,
        transcendentals=Np,
        bytes_accessed=M * K * ib + K * Np * ib + 2 * Np * 4 + M * Np * ob)

    def _compiler_params(need_bytes, semantics=None):
        limit = int(min(max(2 * need_bytes, 32 << 20), 60 << 20))
        if semantics is None:
            return pltpu.CompilerParams(vmem_limit_bytes=limit)
        return pltpu.CompilerParams(dimension_semantics=semantics,
                                    vmem_limit_bytes=limit)

    # Align tile sizes to hardware granules (sublane 16 covers bf16 and f32).
    tm = _round_up(max(tm, 16), 16)
    tn = _round_up(max(tn, _LANE), _LANE)
    tm_eff = tm if M > tm else M          # full-dim block when it fits in one tile
    tn_eff = tn if Np > tn else Np

    # ---------------- Path A: single shot, no grid (no pointless pipeline) ----------------
    single_bytes = M * K * ib + K * Np * ib + 2 * Np * 4 + M * Np * ob
    if single_bytes <= vmem_budget_bytes:
        out = pl.pallas_call(
            _wn_linear_kernel,
            out_shape=jax.ShapeDtypeStruct((M, Np), out_dtype),
            in_specs=[pl.BlockSpec(memory_space=pltpu.MemorySpace.VMEM)] * 4,
            out_specs=pl.BlockSpec(memory_space=pltpu.MemorySpace.VMEM),
            compiler_params=_compiler_params(single_bytes),
            cost_estimate=cost,
        )(x, vt_p, g2, b2)
        return out[:, :N] if Np != N else out

    # ------------- Path B: grid over N only, x fully resident in VMEM -------------
    # Removes the (N_tiles - 1) redundant HBM reads of x that the old 2-D grid did.
    n_tiles = pl.cdiv(Np, tn_eff)
    resident_bytes = (2 * M * K * ib            # x block (count double buffers, conservative)
                      + 2 * K * tn_eff * ib     # vt tiles
                      + 2 * M * tn_eff * ob     # out tiles
                      + 4 * 2 * tn_eff * 4)     # g / b tiles
    if resident_bytes <= vmem_budget_bytes:
        out = pl.pallas_call(
            _wn_linear_kernel,
            out_shape=jax.ShapeDtypeStruct((M, Np), out_dtype),
            grid_spec=pltpu.PrefetchScalarGridSpec(
                num_scalar_prefetch=0,
                grid=(n_tiles,),
                in_specs=[
                    pl.BlockSpec((M, K), lambda n: (0, 0)),        # x resident (constant index)
                    pl.BlockSpec((K, tn_eff), lambda n: (0, n)),
                    pl.BlockSpec((1, tn_eff), lambda n: (0, n)),
                    pl.BlockSpec((1, tn_eff), lambda n: (0, n)),
                ],
                out_specs=pl.BlockSpec((M, tn_eff), lambda n: (0, n)),
            ),
            compiler_params=_compiler_params(resident_bytes, ("parallel",)),
            cost_estimate=cost,
        )(x, vt_p, g2, b2)
        return out[:, :N] if Np != N else out

    # ------------- Path C: 2-D grid; per-tile norm recompute; both axes parallel -------------
    def _tiled_bytes(tm_, tn_):
        return (2 * tm_ * K * ib + 2 * K * tn_ * ib
                + 2 * tm_ * tn_ * ob + 4 * 2 * tn_ * 4)

    tiled_bytes = _tiled_bytes(tm_eff, tn_eff)
    for _ in range(16):
        if tiled_bytes <= vmem_budget_bytes:
            break
        if tm_eff > 128 and tm_eff >= tn_eff:
            tm_eff = max(128, _round_up(tm_eff // 2, 16))
        elif tn_eff > 128:
            tn_eff = max(128, _round_up(tn_eff // 2, _LANE))
        else:
            # TODO(synk): add a K-tiling fallback for very large bottleneck_dim.
            break
        tiled_bytes = _tiled_bytes(tm_eff, tn_eff)

    m_tiles = pl.cdiv(M, tm_eff)
    n_tiles = pl.cdiv(Np, tn_eff)

    # Leading ("most parallel work") axis = the one with more tiles, so the second
    # v7x TensorCore is busy whether batch or class_num is the large dimension.
    if m_tiles >= n_tiles:
        grid = (m_tiles, n_tiles)
        x_map = lambda i, j: (i, 0)
        w_map = lambda i, j: (0, j)
        o_map = lambda i, j: (i, j)
    else:
        grid = (n_tiles, m_tiles)
        x_map = lambda i, j: (j, 0)
        w_map = lambda i, j: (0, i)
        o_map = lambda i, j: (j, i)

    out = pl.pallas_call(
        _wn_linear_kernel,
        out_shape=jax.ShapeDtypeStruct((M, Np), out_dtype),
        grid_spec=pltpu.PrefetchScalarGridSpec(
            num_scalar_prefetch=0,
            grid=grid,
            in_specs=[
                pl.BlockSpec((tm_eff, K), x_map),
                pl.BlockSpec((K, tn_eff), w_map),
                pl.BlockSpec((1, tn_eff), w_map),
                pl.BlockSpec((1, tn_eff), w_map),
            ],
            out_specs=pl.BlockSpec((tm_eff, tn_eff), o_map),
        ),
        compiler_params=_compiler_params(tiled_bytes, ("parallel", "parallel")),
        cost_estimate=cost,
    )(x, vt_p, g2, b2)
    return out[:, :N] if Np != N else out


def init_params(key, class_num, bottleneck_dim):
    """Synthetic init mimicking weight_norm(nn.Linear) + init_weights.

    V is xavier-normal, g = ||V||_row (so W == V at init), b = 0.
    V is returned TRANSPOSED as vt:(K, N) -> transpose happens once at init, never
    per forward call.
    """
    std = jnp.sqrt(2.0 / (class_num + bottleneck_dim))
    v = jax.random.normal(key, (class_num, bottleneck_dim), dtype=jnp.float32) * std
    g = jnp.sqrt(jnp.sum(v * v, axis=-1))            # (N,)
    b = jnp.zeros((class_num,), dtype=jnp.float32)
    return jnp.transpose(v), g, b                    # vt: (K, N)


def _ref_forward(x, vt, g, b):
    vt32 = vt.astype(jnp.float32)
    norm = jnp.sqrt(jnp.sum(vt32 * vt32, axis=0, keepdims=True))
    w = vt32 * (jnp.reshape(g, (1, -1)) / norm)
    return x.astype(jnp.float32) @ w + jnp.reshape(b, (1, -1))


if __name__ == "__main__":
    key = jax.random.PRNGKey(0)
    k1, k2, k3, k4, k5 = jax.random.split(key, 5)

    # ---- module-default shapes (batch=4, bottleneck_dim=256, class_num=10): path A ----
    batch, bottleneck_dim, class_num = 4, 256, 10
    x = jax.random.normal(k1, (batch, bottleneck_dim), dtype=jnp.float32)
    vt, g, b = init_params(k2, class_num, bottleneck_dim)
    y_ref = _ref_forward(x, vt, g, b)

    y32 = jax.jit(functools.partial(feat_classifier_forward,
                                    use_bf16_matmul=False))(x, vt, g, b)
    jax.block_until_ready(y32)
    assert y32.shape == (batch, class_num)
    assert jnp.allclose(y32, y_ref, atol=1e-4, rtol=1e-4)

    y16 = jax.jit(feat_classifier_forward)(x, vt, g, b)     # bf16-at-HBM default
    jax.block_until_ready(y16)
    assert jnp.allclose(y16, y_ref, atol=5e-2, rtol=5e-2)

    # ---- N-tiled, x-resident grid path (path B), forced via a tiny VMEM budget ----
    M2, N2, K2 = 32, 300, 256
    x2 = jax.random.normal(k3, (M2, K2), dtype=jnp.float32)
    vt2, g2v, b2v = init_params(k4, N2, K2)
    y2_ref = _ref_forward(x2, vt2, g2v, b2v)
    y2 = jax.jit(functools.partial(feat_classifier_forward, tn=128,
                                   vmem_budget_bytes=220_000))(x2, vt2, g2v, b2v)
    jax.block_until_ready(y2)
    assert y2.shape == (M2, N2)
    assert jnp.allclose(y2, y2_ref, atol=5e-2, rtol=5e-2)

    # ---- 2-D tiled grid path (path C), forced via a tiny VMEM budget ----
    M3 = 64
    x3 = jax.random.normal(k5, (M3, K2), dtype=jnp.float32)
    y3_ref = _ref_forward(x3, vt2, g2v, b2v)
    y3 = jax.jit(functools.partial(feat_classifier_forward, tm=32, tn=128,
                                   vmem_budget_bytes=220_000))(x3, vt2, g2v, b2v)
    jax.block_until_ready(y3)
    assert y3.shape == (M3, N2)
    assert jnp.allclose(y3, y3_ref, atol=5e-2, rtol=5e-2)

    print("KERNEL_OK")
</pallas_src>

<mosaic_0001>
module attributes {stable_mosaic.version = 11 : i64} {
  func.func @_wn_linear_kernel(%arg0: memref<4x256xf32, #tpu.memory_space<vmem>>, %arg1: memref<256x128xf32, #tpu.memory_space<vmem>>, %arg2: memref<1x128xf32, #tpu.memory_space<vmem>>, %arg3: memref<1x128xf32, #tpu.memory_space<vmem>>, %arg4: memref<4x128xf32, #tpu.memory_space<vmem>>) attributes {dimension_semantics = [], scalar_prefetch = 0 : i64, scratch_operands = 0 : i64, tpu.core_type = #tpu.core_type<tc>} {
    %c0 = arith.constant 0 : index
    %c0_0 = arith.constant 0 : index
    %0 = vector.load %arg1[%c0, %c0_0] : memref<256x128xf32, #tpu.memory_space<vmem>>, vector<256x128xf32>
    %1 = arith.mulf %0, %0 : vector<256x128xf32>
    %cst = arith.constant dense<0.000000e+00> : vector<128xf32>
    %2 = vector.multi_reduction <add>, %1, %cst [0] : vector<256x128xf32> to vector<128xf32>
    %3 = vector.shape_cast %2 : vector<128xf32> to vector<1x128xf32>
    %cst_1 = arith.constant 9.99999996E-13 : f32
    %4 = vector.broadcast %cst_1 : f32 to vector<1x128xf32>
    %5 = arith.maximumf %3, %4 : vector<1x128xf32>
    %6 = math.rsqrt %5 : vector<1x128xf32>
    %c0_2 = arith.constant 0 : index
    %c0_3 = arith.constant 0 : index
    %7 = vector.load %arg2[%c0_2, %c0_3] : memref<1x128xf32, #tpu.memory_space<vmem>>, vector<1x128xf32>
    %8 = arith.mulf %7, %6 : vector<1x128xf32>
    %9 = vector.broadcast %8 : vector<1x128xf32> to vector<256x128xf32>
    %10 = arith.mulf %0, %9 : vector<256x128xf32>
    %c0_4 = arith.constant 0 : index
    %c0_5 = arith.constant 0 : index
    %11 = vector.load %arg0[%c0_4, %c0_5] : memref<4x256xf32, #tpu.memory_space<vmem>>, vector<4x256xf32>
    %cst_6 = arith.constant dense<0.000000e+00> : vector<4x128xf32>
    %12 = tpu.matmul %11, %10, %cst_6 {dimension_numbers = #tpu.dot_dimension_numbers<[1], [0], [0], [1], [0, 0, 1, 1], [], []>} : vector<4x256xf32>, vector<256x128xf32>, vector<4x128xf32> -> vector<4x128xf32>
    %c0_7 = arith.constant 0 : index
    %c0_8 = arith.constant 0 : index
    %13 = vector.load %arg3[%c0_7, %c0_8] : memref<1x128xf32, #tpu.memory_space<vmem>>, vector<1x128xf32>
    %14 = vector.broadcast %13 : vector<1x128xf32> to vector<4x128xf32>
    %15 = arith.addf %12, %14 : vector<4x128xf32>
    %c0_9 = arith.constant 0 : index
    %c0_10 = arith.constant 0 : index
    %16 = vector.load %arg4[%c0_9, %c0_10] : memref<4x128xf32, #tpu.memory_space<vmem>>, vector<4x128xf32>
    tpu.vector_store %arg4[%c0_9, %c0_10], %15 {strides = array<i32>} : memref<4x128xf32, #tpu.memory_space<vmem>>, vector<4x128xf32>,
    return
  }
}

</mosaic_0001>

<bundles_post_ra>
// kernel: feat_classifier_forward.1
= control target key start
LH: loop header
LB: loop body
LE: loop exit
PB: predicated region body
PF: predicated region fallthrough
CT: control target
= control target key end

     0   :  { %s661_s0 = inlined_call_operand.vmem [shape: f32[4,256], index: 0, kind: input, shape index: {}]   ;;  %s662_s1 = inlined_call_operand.vmem [shape: f32[256,128], index: 1, kind: input, shape index: {}]   ;;  %s663_s2 = inlined_call_operand.vmem [shape: f32[1,128], index: 2, kind: input, shape index: {}]   ;;  %s664_s3 = inlined_call_operand.vmem [shape: f32[1,128], index: 3, kind: input, shape index: {}]   ;;  %s665_s4 = inlined_call_operand.hbm [shape: f32[4,128], index: 4, kind: output, shape index: {}]  }
   0x1   :  { %v382_v0 = vld [vmem:[%s662_s1] sm:$0xff]  ;;  %v387_v1 = vld [vmem:[%s662_s1 + $0x8] sm:$0xff]  ;;  %v392_v2 = vld [vmem:[%s662_s1 + $0x10] sm:$0xff] }
   0x2   :  { %v397_v3 = vld [vmem:[%s662_s1 + $0x18] sm:$0xff]  ;;  %v50_v4 = vmul.f32 %v382_v0, %v382_v0  ;;  %v51_v5 = vmul.f32 %v387_v1, %v387_v1  ;;  %v52_v6 = vmul.f32 %v392_v2, %v392_v2  ;;  %v408_v7 = vld [vmem:[%s662_s1 + $0x20] sm:$0xff]  ;;  %v415_v10 = vld [vmem:[%s662_s1 + $0x28] sm:$0xff] }
   0x3   :  { %v53_v8 = vmul.f32 %v397_v3, %v397_v3  ;;  %v54_v11 = vmul.f32 %v408_v7, %v408_v7  ;;  %v422_v13 = vld [vmem:[%s662_s1 + $0x30] sm:$0xff]  ;;  %v55_v14 = vmul.f32 %v415_v10, %v415_v10  ;;  %v429_v16 = vld [vmem:[%s662_s1 + $0x38] sm:$0xff]  ;;  %v436_v19 = vld [vmem:[%s662_s1 + $0x40] sm:$0xff] }
   0x4   :  { %v82_v9 = vadd.f32 %v51_v5, %v50_v4  ;;  %v56_v17 = vmul.f32 %v422_v13, %v422_v13  ;;  %v57_v20 = vmul.f32 %v429_v16, %v429_v16  ;;  %v443_v22 = vld [vmem:[%s661_s0] sm:$0xff] }
   0x6   :  { %v83_v12 = vadd.f32 %v82_v9, %v52_v6 }
   0x8   :  { %v84_v15 = vadd.f32 %v83_v12, %v53_v8 }
   0xa   :  { %v85_v18 = vadd.f32 %v84_v15, %v54_v11 }
   0xc   :  { %v86_v21 = vadd.f32 %v85_v18, %v55_v14 }
   0xd   :  { %9 = vsyncpa [#allocation3], 0  ;;  %v448_v23 = vld [vmem:[%s662_s1 + $0x48] sm:$0xff]  ;;  %v170_v24 = vcombine.high %v443_v22, %v443_v22  ;;  %v58_v25 = vmul.f32 %v436_v19, %v436_v19  ;;  %v457_v27 = vld [vmem:[%s662_s1 + $0x50] sm:$0xff]  ;;  %s353_s29 = smov [#allocation2]  }
   0xe   :  { %v87_v26 = vadd.f32 %v86_v21, %v56_v17  ;;  %v59_v28 = vmul.f32 %v448_v23, %v448_v23  ;;  %v464_v30 = vld [vmem:[%s662_s1 + $0x58] sm:$0xff]  ;;  %v60_v31 = vmul.f32 %v457_v27, %v457_v27  ;;  %v471_v33 = vld [vmem:[%s662_s1 + $0x60] sm:$0xff]  ;;  %v478_v36 = vld [vmem:[%s662_s1 + $0x68] sm:$0xff]  ;;  %s249_s30 = sshll.u32 %s353_s29, 4  ;;  %s250_s30 = int_to_ptr.vmem [resolvable:$true] %s249_s30 }
   0xf   :  { %236 = vmatprep.mubr.f32.mxu0 %v170_v24  ;;  %v61_v34 = vmul.f32 %v464_v30, %v464_v30  ;;  %v62_v37 = vmul.f32 %v471_v33, %v471_v33  ;;  %v485_v39 = vld [vmem:[%s662_s1 + $0x70] sm:$0xff]  ;;  %v63_v40 = vmul.f32 %v478_v36, %v478_v36  ;;  %v492_v42 = vld [vmem:[%s662_s1 + $0x78] sm:$0xff]  ;;  %v499_v45 = vld [vmem:[%s662_s1 + $0x80] sm:$0xff]  ;;  %s329_s5 = scalar_lea.vmem %s250_s30, 64  ;;  %p334_p1 = scmp.lt.s32.totalorder %s250_s30, %s250_s30 }
  0x10   :  { %v88_v29 = vadd.f32 %v87_v26, %v57_v20  ;;  %v64_v43 = vmul.f32 %v485_v39, %v485_v39  ;;  %v65_v46 = vmul.f32 %v492_v42, %v492_v42  ;;  %v506_v48 = vld [vmem:[%s662_s1 + $0x88] sm:$0xff]  ;;  %v66_v49 = vmul.f32 %v499_v45, %v499_v45  ;;  %v513_v51 = vld [vmem:[%s662_s1 + $0x90] sm:$0xff]  ;;  %v520_v54 = vld [vmem:[%s662_s1 + $0x98] sm:$0xff]  ;;  %p330_p0 = scmp.ne.s32.totalorder %s250_s30, %s329_s5  ;;  %p335_p2 = scmp.lt.s32.totalorder %s329_s5, %s329_s5 }
  0x11   :  { %v67_v52 = vmul.f32 %v506_v48, %v506_v48  ;;  %v68_v55 = vmul.f32 %v513_v51, %v513_v51  ;;  %v527_v57 = vld [vmem:[%s662_s1 + $0xa0] sm:$0xff]  ;;  %v69_v58 = vmul.f32 %v520_v54, %v520_v54  ;;  %v534_v60 = vld [vmem:[%s662_s1 + $0xa8] sm:$0xff]  ;;  %v541_v63 = vld [vmem:[%s662_s1 + $0xb0] sm:$0xff] }
  0x12   :  { %v89_v32 = vadd.f32 %v88_v29, %v58_v25  ;;  %v70_v61 = vmul.f32 %v527_v57, %v527_v57  ;;  %v71_v4 = vmul.f32 %v534_v60, %v534_v60  ;;  %v548_v6 = vld [vmem:[%s662_s1 + $0xb8] sm:$0xff]  ;;  %v72_v8 = vmul.f32 %v541_v63, %v541_v63  ;;  %v555_v11 = vld [vmem:[%s662_s1 + $0xc0] sm:$0xff]  ;;  %v562_v15 = vld [vmem:[%s662_s1 + $0xc8] sm:$0xff]  ;;  %p336_p3 = por %p335_p2, %p334_p1 }
  0x13   :  { %v73_v12 = vmul.f32 %v548_v6, %v548_v6  ;;  %v74_v17 = vmul.f32 %v555_v11, %v555_v11  ;;  %v569_v20 = vld [vmem:[%s662_s1 + $0xd0] sm:$0xff]  ;;  %v75_v21 = vmul.f32 %v562_v15, %v562_v15  ;;  %v576_v25 = vld [vmem:[%s662_s1 + $0xd8] sm:$0xff]  ;;  %v583_v29 = vld [vmem:[%s662_s1 + $0xe0] sm:$0xff] }
  0x14   :  { %v90_v35 = vadd.f32 %v89_v32, %v59_v28  ;;  %v76_v26 = vmul.f32 %v569_v20, %v569_v20  ;;  %p337_p4 = pnand %p336_p3, %p330_p0 }
  0x16   :  { %v91_v38 = vadd.f32 %v90_v35, %v60_v31  ;;  %v77_v31 = vmul.f32 %v576_v25, %v576_v25  ;;  %v78_v35 = vmul.f32 %v583_v29, %v583_v29 }
  0x18   :  { %v92_v41 = vadd.f32 %v91_v38, %v61_v34  ;;  %v590_v34 = vld [vmem:[%s662_s1 + $0xe8] sm:$0xff]  ;;  %v597_v38 = vld [vmem:[%s662_s1 + $0xf0] sm:$0xff] }
  0x1a   :  { %v93_v44 = vadd.f32 %v92_v41, %v62_v37 }
  0x1c   :  { %v94_v47 = vadd.f32 %v93_v44, %v63_v40  ;;  %v79_v40 = vmul.f32 %v590_v34, %v590_v34  ;;  %v80_v44 = vmul.f32 %v597_v38, %v597_v38 }
  0x1e   :  { %v95_v50 = vadd.f32 %v94_v47, %v64_v43  ;;  %v604_v43 = vld [vmem:[%s662_s1 + $0xf8] sm:$0xff] }
  0x1f   :  { %v81_v47 = vmul.f32 %v604_v43, %v604_v43 }
  0x20   :  { %v96_v53 = vadd.f32 %v95_v50, %v65_v46 }
  0x22   :  { %v97_v56 = vadd.f32 %v96_v53, %v66_v49 }
  0x24   :  { %v98_v59 = vadd.f32 %v97_v56, %v67_v52 }
  0x26   :  { %v99_v62 = vadd.f32 %v98_v59, %v68_v55 }
  0x28   :  { %v100_v5 = vadd.f32 %v99_v62, %v69_v58 }
  0x2a   :  { %v101_v9 = vadd.f32 %v100_v5, %v70_v61 }
  0x2c   :  { %v102_v14 = vadd.f32 %v101_v9, %v71_v4  ;;  %v124_v4 = vlaneseq }
  0x2e   :  { %v103_v18 = vadd.f32 %v102_v14, %v72_v8  ;;  %v125_v5 = vshrl.u32 %v124_v4, 7  ;;  %v121_v8 = vld [vmem:[%s663_s2] sm:$0x1] }
  0x30   :  { %v104_v24 = vadd.f32 %v103_v18, %v73_v12  ;;  %v126_v9 = vsub.s32 0, %v125_v5 }
  0x32   :  { %v105_v28 = vadd.f32 %v104_v24, %v74_v17 }
  0x34   :  { %v106_v32 = vadd.f32 %v105_v28, %v75_v21 }
  0x36   :  { %v107_v37 = vadd.f32 %v106_v32, %v76_v26 }
  0x38   :  { %v108_v41 = vadd.f32 %v107_v37, %v77_v31 }
  0x3a   :  { %v109_v46 = vadd.f32 %v108_v41, %v78_v35 }
  0x3c   :  { %v110_v49 = vadd.f32 %v109_v46, %v79_v40 }
  0x3e   :  { %v111_v50 = vadd.f32 %v110_v49, %v80_v44 }
  0x40   :  { %v112_v52 = vadd.f32 %v111_v50, %v81_v47 }
  0x42   :  { %v113_v53 = vrot.slane %v112_v52, 4 }
  0x44   :  { %v114_v55 = vadd.f32 %v113_v53, %v112_v52 }
  0x46   :  { %v115_v56 = vrot.slane %v114_v55, 2 }
  0x48   :  { %v116_v58 = vadd.f32 %v115_v56, %v114_v55 }
  0x4a   :  { %v117_v59 = vrot.slane %v116_v58, 1 }
  0x4c   :  { %v118_v61 = vadd.f32 %v117_v59, %v116_v58 }
  0x4e   :  { %v119_v62 = vmax.f32 %v118_v61, 1e-12 }
  0x50   :  { %327 = vrsqrt.f32 %v119_v62 }
  0x5a   :  { %v328_v12 = vpop.eup %327 }
  0x5b   :  { %v122_v14 = vmul.f32 %v328_v12, %v121_v8 }
  0x5d   :  { %v127_v17 = vrot.slane %v122_v14, %v126_v9 }
  0x5f   :  { %v145_v18 = vmul.f32 %v127_v17, %v499_v45  ;;  %v146_v21 = vmul.f32 %v127_v17, %v506_v48  ;;  %v129_v24 = vmul.f32 %v127_v17, %v382_v0  ;;  %v130_v26 = vmul.f32 %v127_v17, %v387_v1 }
  0x60   :  { %v147_v28 = vmul.f32 %v127_v17, %v513_v51  ;;  %v148_v31 = vmul.f32 %v127_v17, %v520_v54  ;;  %v131_v32 = vmul.f32 %v127_v17, %v392_v2  ;;  %v132_v35 = vmul.f32 %v127_v17, %v397_v3 }
  0x61   :  { %v293_v37 = vpack.c.bf16 %v146_v21, %v145_v18  ;;  %v295_v40 = vpack.c.bf16 %v130_v26, %v129_v24  ;;  %v149_v41 = vmul.f32 %v127_v17, %v527_v57  ;;  %v150_v45 = vmul.f32 %v127_v17, %v534_v60 }
  0x62   :  { %v297_v44 = vpack.c.bf16 %v148_v31, %v147_v28  ;;  %v299_v0 = vpack.c.bf16 %v132_v35, %v131_v32  ;;  %v133_v1 = vmul.f32 %v127_v17, %v408_v7  ;;  %v134_v48 = vmul.f32 %v127_v17, %v415_v10 }
  0x63   :  { %294 = vmatprep.subr.bf16.mxu0 %v293_v37  ;;  %v301_v51 = vpack.c.bf16 %v150_v45, %v149_v41  ;;  %v151_v2 = vmul.f32 %v127_v17, %v541_v63  ;;  %v152_v3 = vmul.f32 %v127_v17, %v548_v6  ;;  %v135_v57 = vmul.f32 %v127_v17, %v422_v13 }
  0x64   :  { %296 = vmatpush3.bf16.msra.mxu0 %v295_v40  ;;  %v303_v54 = vpack.c.bf16 %v134_v48, %v133_v1  ;;  %v136_v60 = vmul.f32 %v127_v17, %v429_v16  ;;  %v153_v47 = vmul.f32 %v127_v17, %v555_v11  ;;  %v154_v7 = vmul.f32 %v127_v17, %v562_v15 }
  0x65   :  { %298 = vmatprep.subr.bf16.mxu0 %v297_v44  ;;  %v305_v46 = vpack.c.bf16 %v152_v3, %v151_v2  ;;  %v137_v49 = vmul.f32 %v127_v17, %v436_v19  ;;  %v138_v63 = vmul.f32 %v127_v17, %v448_v23  ;;  %v155_v50 = vmul.f32 %v127_v17, %v569_v20 }
  0x66   :  { %v307_v10 = vpack.c.bf16 %v136_v60, %v135_v57  ;;  %v309_v6 = vpack.c.bf16 %v154_v7, %v153_v47  ;;  %v156_v13 = vmul.f32 %v127_v17, %v576_v25  ;;  %v139_v52 = vmul.f32 %v127_v17, %v457_v27 }
  0x67   :  { %v311_v16 = vpack.c.bf16 %v138_v63, %v137_v49  ;;  %v140_v11 = vmul.f32 %v127_v17, %v464_v30  ;;  %v157_v53 = vmul.f32 %v127_v17, %v583_v29  ;;  %v158_v19 = vmul.f32 %v127_v17, %v590_v34 }
  0x68   :  { %300 = vmatpush3.bf16.msra.mxu0 %v299_v0  ;;  %v313_v15 = vpack.c.bf16 %v156_v13, %v155_v50  ;;  %v141_v55 = vmul.f32 %v127_v17, %v471_v33  ;;  %v142_v20 = vmul.f32 %v127_v17, %v478_v36  ;;  %v159_v56 = vmul.f32 %v127_v17, %v597_v38  ;;  %v257_v38 = vld [vmem:[%s664_s3] ss:$0 sm:$0xff] }
  0x69   :  { %302 = vmatprep.subr.bf16.mxu0 %v301_v51  ;;  %v315_v23 = vpack.c.bf16 %v140_v11, %v139_v52  ;;  %v317_v25 = vpack.c.bf16 %v158_v19, %v157_v53  ;;  %v160_v27 = vmul.f32 %v127_v17, %v604_v43  ;;  %v143_v58 = vmul.f32 %v127_v17, %v485_v39 }
  0x6a   :  { %v319_v30 = vpack.c.bf16 %v142_v20, %v141_v55  ;;  %v144_v29 = vmul.f32 %v127_v17, %v492_v42 }
  0x6b   :  { %v321_v34 = vpack.c.bf16 %v160_v27, %v159_v56 }
  0x6c   :  { %304 = vmatpush3.bf16.msra.mxu0 %v303_v54  ;;  %v323_v59 = vpack.c.bf16 %v144_v29, %v143_v58 }
  0x6d   :  { %306 = vmatprep.subr.bf16.mxu0 %v305_v46 }
  0x70   :  { %308 = vmatpush3.bf16.msra.mxu0 %v307_v10 }
  0x71   :  { %310 = vmatprep.subr.bf16.mxu0 %v309_v6 }
  0x74   :  { %312 = vmatpush3.bf16.msra.mxu0 %v311_v16 }
  0x75   :  { %314 = vmatprep.subr.bf16.mxu0 %v313_v15 }
  0x78   :  { %316 = vmatpush3.bf16.msra.mxu0 %v315_v23 }
  0x79   :  { %318 = vmatprep.subr.bf16.mxu0 %v317_v25 }
  0x7c   :  { %320 = vmatpush3.bf16.msra.mxu0 %v319_v30 }
  0x7d   :  { %322 = vmatprep.subr.bf16.mxu0 %v321_v34 }
  0x80   :  { %324 = vmatpush3.bf16.msra.mxu0 %v323_v59 }
  0x83   :  { %237 = vmatmul.mubr.f32.vlgmr.msra.gmra.mrb[0].mxu0 %v443_v22 }
 0x156   :  { %v290_v33 = vpop.f32.mrb[0].mxu0 }
 0x157   :  { %v291_v36 = vpop.f32.mrb[1].mxu0 }
 0x158   :  { %v292_v43 = vadd.f32 %v291_v36, %v290_v33 }
 0x15a   :  { %v239_v39 = vadd.f32 %v292_v43, %v257_v38 }
 0x15c   :  { %242 = vst [vmem:[#allocation2] sm:$0xf] %v239_v39 }
 0x15d   :  { %340 = shalt.err (!%p337_p4)
}
 0x15e   :  { %s341_s8 = scalar_lea.hbm %s665_s4, 64 }
 0x15f   :  { %p342_p5 = scmp.ne.s32.totalorder %s665_s4, %s341_s8  ;;  %p345_p6 = scmp.lt.u32.totalorder %s341_s8, %s665_s4 }
 0x161   :  { %p347_p7 = pnand %p345_p6, %p342_p5 }
 0x163   :  { %350 = shalt.err (!%p347_p7)
}
 0x164   :  { %252 = dma.vmem_to_hbm [thread:$0]  %s250_s30, 64, %s665_s4, [#allocation3]  }
 0x165   :  { %351 = dma.done.wait [#allocation3], 64  }
 0x166   :  { %352 = vsyncadd [#allocation3], 4294967232 }
 0x167   :  { %256 = vsyncpa [#allocation3], 1 }

</bundles_post_ra>
